<compile_context>
chip_gen: v5e
topology: v5e:2x2
jax: 0.10.0
libtpu: 0.0.40
codegen_flags: <defaults>
</compile_context>

<pallas_src>
import functools
import math

import jax
import jax.numpy as jnp
from jax.experimental import pallas as pl
from jax.experimental.pallas import tpu as pltpu

# --- deterministic module hyperparameters (from LIF.__init__ defaults) -------
DT = 1.0
TC_DECAY = 100.0
TC_TRACE = 20.0
V_THRESH = -52.0
V_REST = -65.0
V_RESET = -65.0
REFRACTORY_PERIOD = 5.0
VOLTAGE_DECAY_FACTOR = math.exp(-DT / TC_DECAY)
# decay*(v - v_rest) + v_rest  ==  decay*v + (1-decay)*v_rest   (FMA form)
V_REST_DECAY_TERM = (1.0 - VOLTAGE_DECAY_FACTOR) * V_REST


def _cdiv(a: int, b: int) -> int:
    return -(-a // b)


def _round_up(x: int, m: int) -> int:
    return ((x + m - 1) // m) * m


def _choose_tb(B: int) -> int:
    """Batch tile: multiple of 32 (int8 sublane packing), <=128 rows, and when
    the batch is large enough, >=2 grid steps so both v7x TensorCores get work
    (inert on single-TC v5e/v6e)."""
    tb = _round_up(min(B, 128), 32)
    if B >= 64:
        tb = min(tb, _round_up(_cdiv(B, 2), 32))
    return tb


def _choose_tn(N: int) -> int:
    """Column tile of the weight / outputs.  Keep the double-buffered bf16
    [N, tn] weight tile under ~12 MiB so state tiles still fit v7x's 64 MiB
    VMEM; halve while it stays a multiple of 128."""
    if N % 128 != 0:
        return N  # non-128-multiple N: keep the full (exempt) lane dim
    tn = N
    while 2 * N * tn * 2 > 12 * 1024 * 1024 and tn % 256 == 0:
        tn //= 2
    return tn


def lif_kernel(weight_ref, voltage_ref, input_spikes_ref, input_voltages_ref,
               refractory_ref, spikes_out_ref, voltage_out_ref, refrac_out_ref,
               spikes_scratch):
    # grid = (batch tiles, weight-column tiles); j is the (inner) column axis.
    j = pl.program_id(1)
    tn = voltage_out_ref.shape[-1]

    # Compute the full spike row once per batch tile; the matmul contraction
    # needs all N source neurons regardless of which output columns we write.
    @pl.when(j == 0)
    def _():
        in_refrac = refractory_ref[...] > 0.0
        pre_v = VOLTAGE_DECAY_FACTOR * voltage_ref[...] + V_REST_DECAY_TERM
        pre_v = pre_v + jnp.where(in_refrac, 0.0, input_voltages_ref[...])
        spk = jnp.logical_or(pre_v >= V_THRESH, input_spikes_ref[...] != 0)
        spikes_scratch[...] = spk.astype(jnp.bfloat16)  # exact 0/1 values

    # Recurrent contribution for this column tile: [tb, N] @ [N, tn] on the MXU
    # (bf16 x bf16 inputs, f32 accumulation).
    rec = jnp.dot(spikes_scratch[...], weight_ref[...],
                  preferred_element_type=jnp.float32)

    # Column-local state update (cheap VPU work, redone per column tile).
    col = pl.multiple_of(j * tn, tn)
    sl = pl.ds(col, tn)
    v_c = voltage_ref[:, sl]
    iv_c = input_voltages_ref[:, sl]
    refrac_c = refractory_ref[:, sl]
    in_refrac_c = refrac_c > 0.0
    spk_c = spikes_scratch[:, sl] > 0.0

    new_v = VOLTAGE_DECAY_FACTOR * v_c + V_REST_DECAY_TERM
    new_v = new_v + jnp.where(in_refrac_c, 0.0, iv_c)
    new_v = new_v + rec
    new_v = jnp.where(in_refrac_c, V_REST, new_v)
    new_v = jnp.where(spk_c, V_RESET, new_v)

    spikes_out_ref[...] = spk_c.astype(jnp.int8)
    voltage_out_ref[...] = new_v
    refrac_out_ref[...] = jnp.where(spk_c, REFRACTORY_PERIOD, refrac_c - DT)


@functools.partial(jax.jit, static_argnames=("tn",))
def lif_forward(weight, voltage, input_spikes, input_voltages, refractory, *,
                tn=None):
    B, N = voltage.shape
    assert weight.shape == (N, N)

    tb = _choose_tb(B)
    if tn is None:
        tn = _choose_tn(N)
    assert N % tn == 0

    # dtype plumbing: bf16 weight (only the weights are bf16-rounded; the 0/1
    # spike LHS is exact), int8 spike streams, f32 everything else.
    w_bf16 = weight.astype(jnp.bfloat16)
    spk_i8 = (input_spikes if input_spikes.dtype == jnp.int8
              else (input_spikes != 0).astype(jnp.int8))
    voltage = voltage.astype(jnp.float32)
    input_voltages = input_voltages.astype(jnp.float32)
    refractory = refractory.astype(jnp.float32)

    # Pad the batch to a multiple of the tile (padded rows are independent:
    # the recurrent matmul is row-wise in the batch dimension).
    Bp = _round_up(B, tb)
    if Bp != B:
        pad = ((0, Bp - B), (0, 0))
        voltage = jnp.pad(voltage, pad)
        spk_i8 = jnp.pad(spk_i8, pad)
        input_voltages = jnp.pad(input_voltages, pad)
        refractory = jnp.pad(refractory, pad)

    grid = (Bp // tb, N // tn)

    state_spec = pl.BlockSpec((tb, N), lambda i, j: (i, 0))   # re-used across j
    weight_spec = pl.BlockSpec((N, tn), lambda i, j: (0, j))
    col_spec = pl.BlockSpec((tb, tn), lambda i, j: (i, j))

    # VMEM budget (double-buffered tiles + spike-row scratch) -> scoped limit.
    vmem_bytes = (2 * N * tn * 2                    # bf16 weight column tile
                  + 2 * tb * N * (4 + 1 + 4 + 4)    # f32/int8/f32/f32 state in
                  + 2 * tb * tn * (1 + 4 + 4)       # int8/f32/f32 outputs
                  + tb * N * 2)                     # bf16 spike-row scratch
    vmem_limit = int(min(max(vmem_bytes + (4 << 20), 32 << 20), 50 << 20))

    spikes_i8, new_v, new_refrac = pl.pallas_call(
        lif_kernel,
        grid=grid,
        in_specs=[weight_spec, state_spec, state_spec, state_spec, state_spec],
        out_specs=[col_spec, col_spec, col_spec],
        out_shape=[
            jax.ShapeDtypeStruct((Bp, N), jnp.int8),     # spikes
            jax.ShapeDtypeStruct((Bp, N), jnp.float32),  # new voltage
            jax.ShapeDtypeStruct((Bp, N), jnp.float32),  # new refractory
        ],
        scratch_shapes=[pltpu.VMEM((tb, N), jnp.bfloat16)],
        compiler_params=pltpu.CompilerParams(
            dimension_semantics=("parallel", "arbitrary"),
            vmem_limit_bytes=vmem_limit),
    )(w_bf16, voltage, spk_i8, input_voltages, refractory)

    if Bp != B:
        spikes_i8 = spikes_i8[:B]
        new_v = new_v[:B]
        new_refrac = new_refrac[:B]
    return spikes_i8.astype(jnp.bool_), new_v, new_refrac


def lif_reference(weight, voltage, input_spikes, input_voltages, refractory):
    """Pure-JAX reference mirroring the PyTorch forward (bf16-rounded weight to
    match the kernel's bf16 MXU path; spike decisions are independent of it)."""
    w = weight.astype(jnp.bfloat16).astype(jnp.float32)
    in_refrac = refractory > 0.0
    new_v = VOLTAGE_DECAY_FACTOR * voltage + V_REST_DECAY_TERM
    new_v = new_v + jnp.where(in_refrac, 0.0, input_voltages)
    new_spikes = jnp.logical_or(new_v >= V_THRESH, input_spikes != 0)
    new_v = new_v + new_spikes.astype(jnp.float32) @ w
    new_v = jnp.where(in_refrac, V_REST, new_v)
    new_v = jnp.where(new_spikes, V_RESET, new_v)
    new_refrac = jnp.where(new_spikes, REFRACTORY_PERIOD, refractory - DT)
    return new_spikes, new_v, new_refrac


if __name__ == "__main__":
    B, N = 64, 256   # small deterministic example (batch of states, N neurons)

    key = jax.random.PRNGKey(0)
    k_w, k_v, k_is, k_iv, k_r = jax.random.split(key, 5)

    weight = 0.1 * jax.random.normal(k_w, (N, N), dtype=jnp.float32)
    voltage = V_REST + 14.0 * jax.random.uniform(k_v, (B, N), dtype=jnp.float32)
    input_spikes = (jax.random.uniform(k_is, (B, N)) < 0.1).astype(jnp.int8)
    input_voltages = 2.0 * jax.random.uniform(k_iv, (B, N), dtype=jnp.float32)
    refractory = jnp.where(jax.random.uniform(k_r, (B, N)) < 0.2, 3.0, 0.0
                           ).astype(jnp.float32)

    ref_spikes, ref_v, ref_refrac = lif_reference(
        weight, voltage, input_spikes, input_voltages, refractory)

    # 1) auto tiling (single weight column tile: tn == N)
    spikes, new_v, new_refrac = lif_forward(
        weight, voltage, input_spikes, input_voltages, refractory)
    jax.block_until_ready((spikes, new_v, new_refrac))
    assert spikes.dtype == jnp.bool_
    assert bool(jnp.all(spikes == ref_spikes))
    assert bool(jnp.allclose(new_v, ref_v, atol=1e-3, rtol=1e-5))
    assert bool(jnp.allclose(new_refrac, ref_refrac, atol=1e-5))

    # 2) forced column tiling (exercises the large-N / v7x path: weight tiled
    #    over its output dimension, spike row computed once per batch tile)
    spikes2, new_v2, new_refrac2 = lif_forward(
        weight, voltage, input_spikes, input_voltages, refractory, tn=128)
    jax.block_until_ready((spikes2, new_v2, new_refrac2))
    assert bool(jnp.all(spikes2 == ref_spikes))
    assert bool(jnp.allclose(new_v2, ref_v, atol=1e-3, rtol=1e-5))
    assert bool(jnp.allclose(new_refrac2, ref_refrac, atol=1e-5))

    print("KERNEL_OK")
</pallas_src>

<mosaic_0001>
module attributes {stable_mosaic.version = 11 : i64} {
  func.func @lif_kernel(%arg0: i32, %arg1: i32, %arg2: memref<256x256xbf16, #tpu.memory_space<vmem>>, %arg3: memref<32x256xf32, #tpu.memory_space<vmem>>, %arg4: memref<32x256xi8, #tpu.memory_space<vmem>>, %arg5: memref<32x256xf32, #tpu.memory_space<vmem>>, %arg6: memref<32x256xf32, #tpu.memory_space<vmem>>, %arg7: memref<32x256xi8, #tpu.memory_space<vmem>>, %arg8: memref<32x256xf32, #tpu.memory_space<vmem>>, %arg9: memref<32x256xf32, #tpu.memory_space<vmem>>, %arg10: memref<32x256xbf16, #tpu.memory_space<vmem>>) attributes {dimension_semantics = [#tpu.dimension_semantics<parallel>, #tpu.dimension_semantics<arbitrary>], iteration_bounds = array<i64: 2, 1>, scalar_prefetch = 0 : i64, scratch_operands = 1 : i64, tpu.core_type = #tpu.core_type<tc>, window_params = [{transform_indices = @transform_0, window_bounds = array<i64: 256, 256>}, {transform_indices = @transform_1, window_bounds = array<i64: 32, 256>}, {transform_indices = @transform_2, window_bounds = array<i64: 32, 256>}, {transform_indices = @transform_3, window_bounds = array<i64: 32, 256>}, {transform_indices = @transform_4, window_bounds = array<i64: 32, 256>}, {transform_indices = @transform_5, window_bounds = array<i64: 32, 256>}, {transform_indices = @transform_6, window_bounds = array<i64: 32, 256>}, {transform_indices = @transform_7, window_bounds = array<i64: 32, 256>}]} {
    %c0_i32 = arith.constant 0 : i32
    %0 = arith.cmpi eq, %arg1, %c0_i32 : i32
    %1 = arith.extui %0 : i1 to i32
    %c0_i32_0 = arith.constant 0 : i32
    %2 = arith.cmpi ne, %1, %c0_i32_0 : i32
    scf.if %2 {
      %c0_23 = arith.constant 0 : index
      %c0_24 = arith.constant 0 : index
      %40 = vector.load %arg6[%c0_23, %c0_24] : memref<32x256xf32, #tpu.memory_space<vmem>>, vector<32x256xf32>
      %cst_25 = arith.constant 0.000000e+00 : f32
      %41 = vector.broadcast %cst_25 : f32 to vector<32x256xf32>
      %42 = arith.cmpf ogt, %40, %41 : vector<32x256xf32>
      %c0_26 = arith.constant 0 : index
      %c0_27 = arith.constant 0 : index
      %43 = vector.load %arg3[%c0_26, %c0_27] : memref<32x256xf32, #tpu.memory_space<vmem>>, vector<32x256xf32>
      %cst_28 = arith.constant 0.990049839 : f32
      %44 = vector.broadcast %cst_28 : f32 to vector<32x256xf32>
      %45 = arith.mulf %44, %43 : vector<32x256xf32>
      %cst_29 = arith.constant -0.646760821 : f32
      %46 = vector.broadcast %cst_29 : f32 to vector<32x256xf32>
      %47 = arith.addf %45, %46 : vector<32x256xf32>
      %c0_30 = arith.constant 0 : index
      %c0_31 = arith.constant 0 : index
      %48 = vector.load %arg5[%c0_30, %c0_31] : memref<32x256xf32, #tpu.memory_space<vmem>>, vector<32x256xf32>
      %cst_32 = arith.constant 0.000000e+00 : f32
      %49 = vector.broadcast %cst_32 : f32 to vector<32x256xf32>
      %50 = arith.select %42, %49, %48 : vector<32x256xi1>, vector<32x256xf32>
      %51 = arith.addf %47, %50 : vector<32x256xf32>
      %cst_33 = arith.constant -5.200000e+01 : f32
      %52 = vector.broadcast %cst_33 : f32 to vector<32x256xf32>
      %53 = arith.cmpf oge, %51, %52 : vector<32x256xf32>
      %c0_34 = arith.constant 0 : index
      %c0_35 = arith.constant 0 : index
      %54 = vector.load %arg4[%c0_34, %c0_35] : memref<32x256xi8, #tpu.memory_space<vmem>>, vector<32x256xi8>
      %c0_i8 = arith.constant 0 : i8
      %55 = vector.broadcast %c0_i8 : i8 to vector<32x256xi8>
      %56 = arith.cmpi ne, %54, %55 : vector<32x256xi8>
      %57 = arith.ori %53, %56 : vector<32x256xi1>
      %58 = arith.extui %57 : vector<32x256xi1> to vector<32x256xi32>
      %59 = arith.sitofp %58 : vector<32x256xi32> to vector<32x256xf32>
      %60 = arith.truncf %59 : vector<32x256xf32> to vector<32x256xbf16>
      %c0_36 = arith.constant 0 : index
      %c0_37 = arith.constant 0 : index
      %61 = vector.load %arg10[%c0_36, %c0_37] : memref<32x256xbf16, #tpu.memory_space<vmem>>, vector<32x256xbf16>
      tpu.vector_store %arg10[%c0_36, %c0_37], %60 {strides = array<i32>} : memref<32x256xbf16, #tpu.memory_space<vmem>>, vector<32x256xbf16>,
    } else {
    }
    %c0 = arith.constant 0 : index
    %c0_1 = arith.constant 0 : index
    %3 = vector.load %arg10[%c0, %c0_1] : memref<32x256xbf16, #tpu.memory_space<vmem>>, vector<32x256xbf16>
    %c0_2 = arith.constant 0 : index
    %c0_3 = arith.constant 0 : index
    %4 = vector.load %arg2[%c0_2, %c0_3] : memref<256x256xbf16, #tpu.memory_space<vmem>>, vector<256x256xbf16>
    %cst = arith.constant dense<0.000000e+00> : vector<32x256xf32>
    %5 = tpu.matmul %3, %4, %cst {dimension_numbers = #tpu.dot_dimension_numbers<[1], [0], [0], [1], [0, 0, 1, 1], [], []>} : vector<32x256xbf16>, vector<256x256xbf16>, vector<32x256xf32> -> vector<32x256xf32>
    %c256_i32 = arith.constant 256 : i32
    %6 = arith.muli %arg1, %c256_i32 : i32
    %7 = tpu.assume_multiple %6, 256 : i32
    %c0_4 = arith.constant 0 : index
    %8 = arith.index_cast %7 : i32 to index
    %9 = vector.load %arg3[%c0_4, %8] : memref<32x256xf32, #tpu.memory_space<vmem>>, vector<32x256xf32>
    %c0_5 = arith.constant 0 : index
    %10 = arith.index_cast %7 : i32 to index
    %11 = vector.load %arg5[%c0_5, %10] : memref<32x256xf32, #tpu.memory_space<vmem>>, vector<32x256xf32>
    %c0_6 = arith.constant 0 : index
    %12 = arith.index_cast %7 : i32 to index
    %13 = vector.load %arg6[%c0_6, %12] : memref<32x256xf32, #tpu.memory_space<vmem>>, vector<32x256xf32>
    %cst_7 = arith.constant 0.000000e+00 : f32
    %14 = vector.broadcast %cst_7 : f32 to vector<32x256xf32>
    %15 = arith.cmpf ogt, %13, %14 : vector<32x256xf32>
    %c0_8 = arith.constant 0 : index
    %16 = arith.index_cast %7 : i32 to index
    %17 = vector.load %arg10[%c0_8, %16] : memref<32x256xbf16, #tpu.memory_space<vmem>>, vector<32x256xbf16>
    %cst_9 = arith.constant 0.000000e+00 : bf16
    %18 = vector.broadcast %cst_9 : bf16 to vector<32x256xbf16>
    %19 = arith.cmpf ogt, %17, %18 : vector<32x256xbf16>
    %cst_10 = arith.constant 0.990049839 : f32
    %20 = vector.broadcast %cst_10 : f32 to vector<32x256xf32>
    %21 = arith.mulf %20, %9 : vector<32x256xf32>
    %cst_11 = arith.constant -0.646760821 : f32
    %22 = vector.broadcast %cst_11 : f32 to vector<32x256xf32>
    %23 = arith.addf %21, %22 : vector<32x256xf32>
    %cst_12 = arith.constant 0.000000e+00 : f32
    %24 = vector.broadcast %cst_12 : f32 to vector<32x256xf32>
    %25 = arith.select %15, %24, %11 : vector<32x256xi1>, vector<32x256xf32>
    %26 = arith.addf %23, %25 : vector<32x256xf32>
    %27 = arith.addf %26, %5 : vector<32x256xf32>
    %cst_13 = arith.constant -6.500000e+01 : f32
    %28 = vector.broadcast %cst_13 : f32 to vector<32x256xf32>
    %29 = arith.select %15, %28, %27 : vector<32x256xi1>, vector<32x256xf32>
    %cst_14 = arith.constant -6.500000e+01 : f32
    %30 = vector.broadcast %cst_14 : f32 to vector<32x256xf32>
    %31 = arith.select %19, %30, %29 : vector<32x256xi1>, vector<32x256xf32>
    %32 = arith.extui %19 : vector<32x256xi1> to vector<32x256xi8>
    %c0_15 = arith.constant 0 : index
    %c0_16 = arith.constant 0 : index
    %33 = vector.load %arg7[%c0_15, %c0_16] : memref<32x256xi8, #tpu.memory_space<vmem>>, vector<32x256xi8>
    tpu.vector_store %arg7[%c0_15, %c0_16], %32 {strides = array<i32>} : memref<32x256xi8, #tpu.memory_space<vmem>>, vector<32x256xi8>,
    %c0_17 = arith.constant 0 : index
    %c0_18 = arith.constant 0 : index
    %34 = vector.load %arg8[%c0_17, %c0_18] : memref<32x256xf32, #tpu.memory_space<vmem>>, vector<32x256xf32>
    tpu.vector_store %arg8[%c0_17, %c0_18], %31 {strides = array<i32>} : memref<32x256xf32, #tpu.memory_space<vmem>>, vector<32x256xf32>,
    %cst_19 = arith.constant 1.000000e+00 : f32
    %35 = vector.broadcast %cst_19 : f32 to vector<32x256xf32>
    %36 = arith.subf %13, %35 : vector<32x256xf32>
    %cst_20 = arith.constant 5.000000e+00 : f32
    %37 = vector.broadcast %cst_20 : f32 to vector<32x256xf32>
    %38 = arith.select %19, %37, %36 : vector<32x256xi1>, vector<32x256xf32>
    %c0_21 = arith.constant 0 : index
    %c0_22 = arith.constant 0 : index
    %39 = vector.load %arg9[%c0_21, %c0_22] : memref<32x256xf32, #tpu.memory_space<vmem>>, vector<32x256xf32>
    tpu.vector_store %arg9[%c0_21, %c0_22], %38 {strides = array<i32>} : memref<32x256xf32, #tpu.memory_space<vmem>>, vector<32x256xf32>,
    return
  }
  func.func @transform_0(%arg0: i32, %arg1: i32) -> (i32, i32) {
    %c0_i32 = arith.constant 0 : i32
    %c0_i32_0 = arith.constant 0 : i32
    return %c0_i32, %arg1 : i32, i32
  }
  func.func @transform_1(%arg0: i32, %arg1: i32) -> (i32, i32) {
    %c0_i32 = arith.constant 0 : i32
    %c0_i32_0 = arith.constant 0 : i32
    return %arg0, %c0_i32 : i32, i32
  }
  func.func @transform_2(%arg0: i32, %arg1: i32) -> (i32, i32) {
    %c0_i32 = arith.constant 0 : i32
    %c0_i32_0 = arith.constant 0 : i32
    return %arg0, %c0_i32 : i32, i32
  }
  func.func @transform_3(%arg0: i32, %arg1: i32) -> (i32, i32) {
    %c0_i32 = arith.constant 0 : i32
    %c0_i32_0 = arith.constant 0 : i32
    return %arg0, %c0_i32 : i32, i32
  }
  func.func @transform_4(%arg0: i32, %arg1: i32) -> (i32, i32) {
    %c0_i32 = arith.constant 0 : i32
    %c0_i32_0 = arith.constant 0 : i32
    return %arg0, %c0_i32 : i32, i32
  }
  func.func @transform_5(%arg0: i32, %arg1: i32) -> (i32, i32) {
    %c0_i32 = arith.constant 0 : i32
    return %arg0, %arg1 : i32, i32
  }
  func.func @transform_6(%arg0: i32, %arg1: i32) -> (i32, i32) {
    %c0_i32 = arith.constant 0 : i32
    return %arg0, %arg1 : i32, i32
  }
  func.func @transform_7(%arg0: i32, %arg1: i32) -> (i32, i32) {
    %c0_i32 = arith.constant 0 : i32
    return %arg0, %arg1 : i32, i32
  }
}

</mosaic_0001>

<bundles_post_ra>
// kernel: lif_forward.1
= control target key start
LH: loop header
LB: loop body
LE: loop exit
PB: predicated region body
PF: predicated region fallthrough
CT: control target
= control target key end

     0   :  { %13 = vsyncpa [#allocation4], 0  ;;  %s2379_s0 = inlined_call_operand.vmem [shape: bf16[256,256], index: 0, kind: input, shape index: {}]   ;;  %s2380_s1 = inlined_call_operand.vmem [shape: f32[64,256], index: 1, kind: input, shape index: {}]   ;;  %s2381_s2 = inlined_call_operand.vmem [shape: s8[64,256], index: 2, kind: input, shape index: {}]   ;;  %s2382_s3 = inlined_call_operand.vmem [shape: f32[64,256], index: 3, kind: input, shape index: {}]   ;;  %s2383_s4 = inlined_call_operand.vmem [shape: f32[64,256], index: 4, kind: input, shape index: {}]   ;;  %s2384_s5 = inlined_call_operand.vmem [shape: s8[64,256], index: 5, kind: output, shape index: {0}]   ;;  %s2385_s6 = inlined_call_operand.hbm [shape: f32[64,256], index: 6, kind: output, shape index: {1}]   ;;  %s2386_s7 = inlined_call_operand.hbm [shape: f32[64,256], index: 7, kind: output, shape index: {2}]  }
   0x1   :  { %15 = vsyncpa [#allocation4 + $0x1], 0 }
   0x2   :  { %16 = vsyncpa [#allocation6], 0 }
   0x3   :  { %18 = vsyncpa [#allocation6 + $0x1], 0  ;;  %s1761_s24 = smov 0   ;;  %s1763_s25 = smov 0  }
   0x4   :  { %s1765_s26 = smov 0   ;;  %s1767_s27 = smov 0  }
   0x5   :  { %s1769_s28 = smov 0   ;;  %s1771_s29 = smov 0  }
   0x6 LB: > { %2393 = sst [smem:[#allocation9_spill]] %s1711_s28  ;;  %s1305_s30 = sadd.s32 4294967295, %s1715_s29   ;;  %s1715_s29 = sphi %s1771_s29, %s24_s29   ;;  %s1711_s28 = sphi %s1769_s28, %s2404_s28   ;;  %s1707_s27 = sphi %s1767_s27, %s2403_s27   ;;  %s1703_s26 = sphi %s1765_s26, %s2407_s26   ;;  %s1699_s25 = sphi %s1763_s25, %s2406_s25   ;;  %s1695_s24 = sphi %s1761_s24, %s2405_s24  }
   0x7   : > { %s1306_s8 = sadd.s32 4294967294, %s1715_s29   ;;  %s36_s9 = sadd.s32 1, %s1711_s28 }
   0x8   : > { %s203_s10 = sadd.s32 1, %s1703_s26  ;;  %p38_p0 = scmp.ge.s32.totalorder %s36_s9, 2 }
   0x9   : > { %p213_p1 = scmp.ne.s32.totalorder %s1703_s26, %s1699_s25  ;;  %p214_p2 = scmp.eq.s32.totalorder %s1305_s30, 1 }
   0xa   : > { %p219_p3 = scmp.ne.s32.totalorder %s1699_s25, %s1695_s24  ;;  %s2409_s9 = smov (%p38_p0, %s36_s9), 0 }
   0xb   : > { %2394 = sst [smem:[#allocation10_spill]] %s2409_s9  ;;  %p1801_p4 = por %p214_p2, %p213_p1 }
   0xc   : > { %p220_p5 = scmp.eq.s32.totalorder %s1306_s8, 1  ;;  %s198_s12 = ssub.s32 %s1711_s28, %s2409_s9 }
   0xd   : > { %p1310_p6 = scmp.ge.s32.totalorder %s1715_s29, 1  ;;  %p201_p7 = scmp.eq.s32.totalorder %s198_s12, 0 }
   0xe   : > { %p1808_p8 = por %p220_p5, %p219_p3  ;;  %p313_p9 = scmp.lt.s32.totalorder %s1715_s29, 3 }
   0xf   : > { %s1814_s14 = scalar_select %p201_p7, %s1703_s26, %s203_s10  }
  0x10   : > { %p314_p10 = pnand %p1310_p6, %p313_p9 }
  0x11   : > { %s1313_s19 = sshll.u32 (!%p314_p10), %s1707_s27, 2  ;;  %p395_p11 = scmp.lt.s32.totalorder (!%p314_p10), %s1707_s27, 1 }
  0x12   : > { %317 = sbr.rel (%p314_p10) target bundleno = 248 (0xf8), region = 40  ;;  %p389_p12 = scmp.lt.s32.totalorder (!%p314_p10), %s1313_s19, 7 }
  0x13   : > { %s2183_s28 = sand.u32 (!%p314_p10), 1, %s1699_s25   ;;  %s1538_s20 = sshll.u32 (!%p314_p10), %s1707_s27, 6 }
  0x14   : > { %s1311_s17 = sshll.u32 (!%p314_p10), %s2183_s28, 6  ;;  %s1096_s23 = scalar_lea.hbm (!%p314_p10), %s2386_s7, %s1538_s20 }
  0x15   : > { %s1625_s22 = scalar_lea.hbm (!%p314_p10), %s2386_s7, 128 }
  0x17   : > { %v1408_v0 = vld [vmem:[%s2379_s0 + $0x70] sm:$0xf]  ;;  %v1520_v1 = vld [vmem:[%s2379_s0 + $0x74] sm:$0xf0]  ;;  %v1519_v5 = vld [vmem:[%s2379_s0 + $0x74] sm:$0xf] }
  0x18   : > { %v1472_v2 = vld [vmem:[%s2379_s0 + $0xf0] sm:$0xf]  ;;  %v1409_v3 = vor.u32 %v1520_v1, %v1408_v0  ;;  %v1536_v4 = vld [vmem:[%s2379_s0 + $0xf4] sm:$0xf0]  ;;  %v1410_v6 = vld [vmem:[%s2379_s0 + $0x78] sm:$0xf0] }
  0x19   : > { %v1473_v7 = vor.u32 %v1536_v4, %v1472_v2  ;;  %v1413_v8 = vor.u32 %v1519_v5, %v1410_v6  ;;  %v1535_v9 = vld [vmem:[%s2379_s0 + $0xf4] sm:$0xf]  ;;  %v1474_v10 = vld [vmem:[%s2379_s0 + $0xf8] sm:$0xf0]  ;;  %v1400_v11 = vld [vmem:[%s2379_s0 + $0x60] sm:$0xf] }
  0x1a   : > { %800 = vmatpush.bf16.msra.mxu0 %v1409_v3  ;;  %v1477_v12 = vor.u32 %v1535_v9, %v1474_v10  ;;  %v1518_v13 = vld [vmem:[%s2379_s0 + $0x64] sm:$0xf0]  ;;  %v1464_v14 = vld [vmem:[%s2379_s0 + $0xe0] sm:$0xf]  ;;  %v1517_v18 = vld [vmem:[%s2379_s0 + $0x64] sm:$0xf] }
  0x1b   : > { %v1534_v15 = vld [vmem:[%s2379_s0 + $0xe4] sm:$0xf0]  ;;  %819 = vmatpush.bf16.msra.mxu1 %v1473_v7  ;;  %838 = vmatpush.bf16.msra.mxu2 %v1413_v8  ;;  %v1401_v16 = vor.u32 %v1518_v13, %v1400_v11  ;;  %v1402_v19 = vld [vmem:[%s2379_s0 + $0x68] sm:$0xf0]  ;;  %v1533_v20 = vld [vmem:[%s2379_s0 + $0xe4] sm:$0xf] }
  0x1c   : > { %v1465_v17 = vor.u32 %v1534_v15, %v1464_v14  ;;  %857 = vmatpush.bf16.msra.mxu3 %v1477_v12  ;;  %v1405_v21 = vor.u32 %v1517_v18, %v1402_v19  ;;  %v1466_v22 = vld [vmem:[%s2379_s0 + $0xe8] sm:$0xf0]  ;;  %v1392_v23 = vld [vmem:[%s2379_s0 + $0x50] sm:$0xf]  ;;  %v1516_v24 = vld [vmem:[%s2379_s0 + $0x54] sm:$0xf0] }
  0x1d   : > { %v1469_v25 = vor.u32 %v1533_v20, %v1466_v22  ;;  %v1456_v26 = vld [vmem:[%s2379_s0 + $0xd0] sm:$0xf]  ;;  %v1532_v27 = vld [vmem:[%s2379_s0 + $0xd4] sm:$0xf0]  ;;  %v1515_v28 = vld [vmem:[%s2379_s0 + $0x54] sm:$0xf]  ;;  %v1393_v29 = vor.u32 %v1516_v24, %v1392_v23 }
  0x1e   : > { %801 = vmatpush.bf16.msra.mxu0 %v1401_v16  ;;  %v1394_v30 = vld [vmem:[%s2379_s0 + $0x58] sm:$0xf0]  ;;  %v1531_v31 = vld [vmem:[%s2379_s0 + $0xd4] sm:$0xf]  ;;  %v1457_v33 = vor.u32 %v1532_v27, %v1456_v26  ;;  %v1384_v35 = vld [vmem:[%s2379_s0 + $0x40] sm:$0xf] }
  0x1f   : > { %v1458_v32 = vld [vmem:[%s2379_s0 + $0xd8] sm:$0xf0]  ;;  %820 = vmatpush.bf16.msra.mxu1 %v1465_v17  ;;  %839 = vmatpush.bf16.msra.mxu2 %v1405_v21  ;;  %v1397_v34 = vor.u32 %v1515_v28, %v1394_v30  ;;  %v1514_v36 = vld [vmem:[%s2379_s0 + $0x44] sm:$0xf0]  ;;  %v1448_v37 = vld [vmem:[%s2379_s0 + $0xc0] sm:$0xf] }
  0x20   : > { %858 = vmatpush.bf16.msra.mxu3 %v1469_v25  ;;  %v1461_v38 = vor.u32 %v1531_v31, %v1458_v32  ;;  %v1530_v39 = vld [vmem:[%s2379_s0 + $0xc4] sm:$0xf0]  ;;  %v1513_v40 = vld [vmem:[%s2379_s0 + $0x44] sm:$0xf]  ;;  %v1386_v41 = vld [vmem:[%s2379_s0 + $0x48] sm:$0xf0]  ;;  %v1385_v44 = vor.u32 %v1514_v36, %v1384_v35 }
  0x21   : > { %v1529_v42 = vld [vmem:[%s2379_s0 + $0xc4] sm:$0xf]  ;;  %v1450_v43 = vld [vmem:[%s2379_s0 + $0xc8] sm:$0xf0]  ;;  %v1449_v45 = vor.u32 %v1530_v39, %v1448_v37  ;;  %v1389_v46 = vor.u32 %v1513_v40, %v1386_v41  ;;  %v1376_v47 = vld [vmem:[%s2379_s0 + $0x30] sm:$0xf] }
  0x22   : > { %802 = vmatpush.bf16.msra.mxu0 %v1393_v29  ;;  %v1512_v48 = vld [vmem:[%s2379_s0 + $0x34] sm:$0xf0]  ;;  %v1440_v49 = vld [vmem:[%s2379_s0 + $0xb0] sm:$0xf]  ;;  %v1453_v50 = vor.u32 %v1529_v42, %v1450_v43  ;;  %v1511_v52 = vld [vmem:[%s2379_s0 + $0x34] sm:$0xf] }
  0x23   : > { %821 = vmatpush.bf16.msra.mxu1 %v1457_v33  ;;  %840 = vmatpush.bf16.msra.mxu2 %v1397_v34  ;;  %v1528_v51 = vld [vmem:[%s2379_s0 + $0xb4] sm:$0xf0]  ;;  %v1378_v53 = vld [vmem:[%s2379_s0 + $0x38] sm:$0xf0]  ;;  %v1527_v54 = vld [vmem:[%s2379_s0 + $0xb4] sm:$0xf]  ;;  %v1377_v56 = vor.u32 %v1512_v48, %v1376_v47 }
  0x24   : > { %859 = vmatpush.bf16.msra.mxu3 %v1461_v38  ;;  %v1442_v55 = vld [vmem:[%s2379_s0 + $0xb8] sm:$0xf0]  ;;  %v1441_v57 = vor.u32 %v1528_v51, %v1440_v49  ;;  %v1381_v58 = vor.u32 %v1511_v52, %v1378_v53  ;;  %v1368_v59 = vld [vmem:[%s2379_s0 + $0x20] sm:$0xf]  ;;  %v1510_v60 = vld [vmem:[%s2379_s0 + $0x24] sm:$0xf0] }
  0x25   : > { %v1432_v61 = vld [vmem:[%s2379_s0 + $0xa0] sm:$0xf]  ;;  %v1445_v62 = vor.u32 %v1527_v54, %v1442_v55  ;;  %v1526_v63 = vld [vmem:[%s2379_s0 + $0xa4] sm:$0xf0]  ;;  %v1509_v0 = vld [vmem:[%s2379_s0 + $0x24] sm:$0xf]  ;;  %v1369_v4 = vor.u32 %v1510_v60, %v1368_v59 }
  0x26   : > { %803 = vmatpush.bf16.msra.mxu0 %v1385_v44  ;;  %v1370_v1 = vld [vmem:[%s2379_s0 + $0x28] sm:$0xf0]  ;;  %v1525_v2 = vld [vmem:[%s2379_s0 + $0xa4] sm:$0xf]  ;;  %v1360_v5 = vld [vmem:[%s2379_s0 + $0x10] sm:$0xf]  ;;  %v1433_v6 = vor.u32 %v1526_v63, %v1432_v61 }
  0x27   : > { %822 = vmatpush.bf16.msra.mxu1 %v1449_v45  ;;  %841 = vmatpush.bf16.msra.mxu2 %v1389_v46  ;;  %v1434_v3 = vld [vmem:[%s2379_s0 + $0xa8] sm:$0xf0]  ;;  %v1373_v7 = vor.u32 %v1509_v0, %v1370_v1  ;;  %v1508_v8 = vld [vmem:[%s2379_s0 + $0x14] sm:$0xf0]  ;;  %v1424_v9 = vld [vmem:[%s2379_s0 + $0x90] sm:$0xf] }
  0x28   : > { %860 = vmatpush.bf16.msra.mxu3 %v1453_v50  ;;  %v1524_v10 = vld [vmem:[%s2379_s0 + $0x94] sm:$0xf0]  ;;  %v1437_v11 = vor.u32 %v1525_v2, %v1434_v3  ;;  %v1507_v12 = vld [vmem:[%s2379_s0 + $0x14] sm:$0xf]  ;;  %v1362_v13 = vld [vmem:[%s2379_s0 + $0x18] sm:$0xf0]  ;;  %v1361_v16 = vor.u32 %v1508_v8, %v1360_v5 }
  0x29   : > { %v1523_v14 = vld [vmem:[%s2379_s0 + $0x94] sm:$0xf]  ;;  %v1426_v15 = vld [vmem:[%s2379_s0 + $0x98] sm:$0xf0]  ;;  %v1352_v17 = vld [vmem:[%s2379_s0] sm:$0xf]  ;;  %v1425_v19 = vor.u32 %v1524_v10, %v1424_v9  ;;  %v1365_v20 = vor.u32 %v1507_v12, %v1362_v13 }
  0x2a   : > { %804 = vmatpush.bf16.msra.mxu0 %v1377_v56  ;;  %v1506_v18 = vld [vmem:[%s2379_s0 + $0x4] sm:$0xf0]  ;;  %s1993_s15 = scalar_select %p395_p11, %s1707_s27, 1  ;;  %v1416_v21 = vld [vmem:[%s2379_s0 + $0x80] sm:$0xf]  ;;  %v1429_v23 = vor.u32 %v1523_v14, %v1426_v15 }
  0x2b   : > { %823 = vmatpush.bf16.msra.mxu1 %v1441_v57  ;;  %842 = vmatpush.bf16.msra.mxu2 %v1381_v58  ;;  %v1522_v22 = vld [vmem:[%s2379_s0 + $0x84] sm:$0xf0]  ;;  %s2411_s19 = smov (!%p389_p12, %s1313_s19), 7  ;;  %v1505_v24 = vld [vmem:[%s2379_s0 + $0x4] sm:$0xf]  ;;  %v1353_v28 = vor.u32 %v1506_v18, %v1352_v17  ;;  %v1717_v58 = vmov 0  }
  0x2c   : > { %861 = vmatpush.bf16.msra.mxu3 %v1445_v62  ;;  %v1354_v25 = vld [vmem:[%s2379_s0 + $0x8] sm:$0xf0]  ;;  %s1497_s8 = sshll.u32 %s1993_s15, 4  ;;  %v1521_v26 = vld [vmem:[%s2379_s0 + $0x84] sm:$0xf]  ;;  %s1496_s18 = sshll.u32 %s2411_s19, 4  ;;  %v1417_v31 = vor.u32 %v1522_v22, %v1416_v21 }
  0x2d   : > { %v1418_v27 = vld [vmem:[%s2379_s0 + $0x88] sm:$0xf0]  ;;  %s399_s21 = scalar_lea.vmem %s2381_s2, %s1497_s8  ;;  %s2022_s30 = scalar_lea.vmem %s2380_s1, %s1496_s18  ;;  %v1357_v32 = vor.u32 %v1505_v24, %v1354_v25 }
  0x2e   : > { %805 = vmatpush.bf16.msra.mxu0 %v1369_v4  ;;  %s2027_s12 = scalar_lea.vmem %s2382_s3, %s1496_s18  ;;  %v506_v29 = vld [vmem:[%s399_s21] sm:$0xff]  ;;  %v507_v30 = vld [vmem:[%s399_s21 + $0x8] sm:$0xff]  ;;  %s2032_s16 = scalar_lea.vmem %s2383_s4, %s1496_s18  ;;  %v452_v35 = vld [vmem:[%s2022_s30 + $0x10] sm:$0xff]  ;;  %v1421_v36 = vor.u32 %v1521_v26, %v1418_v27 }
  0x2f   : > { %824 = vmatpush.bf16.msra.mxu1 %v1433_v6  ;;  %843 = vmatpush.bf16.msra.mxu2 %v1373_v7  ;;  %v450_v33 = vld [vmem:[%s2022_s30] sm:$0xff]  ;;  %v451_v34 = vld [vmem:[%s2022_s30 + $0x8] sm:$0xff]  ;;  %v2044_v39 = vld [vmem:[%s2032_s16 + $0x10] sm:$0xff]  ;;  %v460_v45 = vmul.f32 0.99004984, %v452_v35  ;;  %vm508_vm4 = vnez %v506_v29  ;;  %vm509_vm5 = vnez %v507_v30  ;;  %s2192_s18 = scalar_lea.vmem [#allocation5], %s1311_s17 }
  0x30   : > { %862 = vmatpush.bf16.msra.mxu3 %v1437_v11  ;;  %v2038_v37 = vld [vmem:[%s2032_s16] sm:$0xff]  ;;  %v2041_v38 = vld [vmem:[%s2032_s16 + $0x8] sm:$0xff]  ;;  %v458_v40 = vmul.f32 0.99004984, %v450_v33  ;;  %v2047_v41 = vld [vmem:[%s2032_s16 + $0x18] sm:$0xff]  ;;  %vm2390_vm2 = vcmp.gt.f32.partialorder %v2044_v39, 0.0 }
  0x31   : > { %vm442_vm0 = vcmp.gt.f32.partialorder %v2038_v37, 0.0  ;;  %vm443_vm1 = vcmp.gt.f32.partialorder %v2041_v38, 0.0  ;;  %v453_v42 = vld [vmem:[%s2022_s30 + $0x18] sm:$0xff]  ;;  %v474_v43 = vld [vmem:[%s2027_s12] sm:$0xff]  ;;  %vm2389_vm3 = vcmp.gt.f32.partialorder %v2047_v41, 0.0  ;;  %v475_v46 = vld [vmem:[%s2027_s12 + $0x8] sm:$0xff] }
  0x32   : > { %806 = vmatpush.bf16.msra.mxu0 %v1361_v16  ;;  %v459_v44 = vmul.f32 0.99004984, %v451_v34  ;;  %v461_v47 = vmul.f32 0.99004984, %v453_v42  ;;  %v466_v48 = vadd.f32 -0.6467608, %v458_v40 }
  0x33   : > { %825 = vmatpush.bf16.msra.mxu1 %v1425_v19  ;;  %844 = vmatpush.bf16.msra.mxu2 %v1365_v20  ;;  %v476_v49 = vld [vmem:[%s2027_s12 + $0x10] sm:$0xff]  ;;  %v477_v50 = vld [vmem:[%s2027_s12 + $0x18] sm:$0xff]  ;;  %v468_v52 = vadd.f32 -0.6467608, %v460_v45  ;;  %v482_v53 = vsel %vm442_vm0, 0.0, %v474_v43  ;;  %v483_v55 = vsel %vm443_vm1, 0.0, %v475_v46 }
  0x34   : > { %863 = vmatpush.bf16.msra.mxu3 %v1429_v23  ;;  %v467_v51 = vadd.f32 -0.6467608, %v459_v44  ;;  %v469_v54 = vadd.f32 -0.6467608, %v461_v47  ;;  %v484_v56 = vsel %vm2390_vm2, 0.0, %v476_v49  ;;  %v485_v57 = vsel %vm2389_vm3, 0.0, %v477_v50 }
  0x35   : > { %v2067_v59 = vsel %vm508_vm4, 16843009, %v1717_v58  ;;  %v2070_v60 = vsel %vm509_vm5, 16843009, %v1717_v58  ;;  %v2072_v61 = vadd.f32 %v482_v53, %v466_v48  ;;  %v2078_v1 = vadd.f32 %v484_v56, %v468_v52  ;;  %v2085_v7 = vld [vmem:[%s2032_s16 + $0x20] sm:$0xff]  ;;  %v2089_v10 = vld [vmem:[%s2032_s16 + $0x28] sm:$0xff] }
  0x36   : > { %807 = vmatpush.bf16.msra.mxu0 %v1353_v28  ;;  %v512_v62 = vunpack.c.0.s8 %v2067_v59  ;;  %v513_v63 = vunpack.c.0.s8 %v2070_v60  ;;  %v2076_v0 = vadd.f32 %v483_v55, %v467_v51  ;;  %v514_v2 = vunpack.c.1.s8 %v2067_v59  ;;  %v454_v8 = vld [vmem:[%s2022_s30 + $0x20] sm:$0xff]  ;;  %v2092_v11 = vld [vmem:[%s2032_s16 + $0x30] sm:$0xff]  ;;  %v455_v13 = vld [vmem:[%s2022_s30 + $0x28] sm:$0xff]  ;;  %s1097_s9 = sshll.u32 %s2192_s18, 4  ;;  %s1099_s19 = sshll.u32 %s1096_s23, 4  ;;  %s2269_s9 = int_to_ptr.vmem [resolvable:$true] %s1097_s9  ;;  %s2271_s19 = int_to_ptr.hbm [resolvable:$true] %s1099_s19 }
  0x37   : > { %826 = vmatpush.bf16.msra.mxu1 %v1417_v31  ;;  %845 = vmatpush.bf16.msra.mxu2 %v1357_v32  ;;  %v515_v3 = vunpack.c.1.s8 %v2070_v60  ;;  %v2082_v4 = vadd.f32 %v485_v57, %v469_v54  ;;  %vm498_vm6 = vcmp.ge.f32.partialorder %v2072_v61, -52.0  ;;  %vm500_vm8 = vcmp.ge.f32.partialorder %v2078_v1, -52.0  ;;  %v2100_v14 = vld [vmem:[%s2032_s16 + $0x38] sm:$0xff]  ;;  %v456_v15 = vld [vmem:[%s2022_s30 + $0x30] sm:$0xff]  ;;  %v478_v23 = vld [vmem:[%s2027_s12 + $0x20] sm:$0xff]  ;;  %s2275_s15 = scalar_lea.vmem [#allocation3], %s1311_s17 }
  0x38   : > { %864 = vmatpush.bf16.msra.mxu3 %v1421_v36  ;;  %v520_v5 = vpack.c.b16 %v513_v63, %v512_v62  ;;  %vm499_vm7 = vcmp.ge.f32.partialorder %v2076_v0, -52.0  ;;  %vm446_vm11 = vcmp.gt.f32.partialorder %v2085_v7, 0.0  ;;  %v462_v16 = vmul.f32 0.99004984, %v454_v8  ;;  %v457_v18 = vld [vmem:[%s2022_s30 + $0x38] sm:$0xff]  ;;  %v479_v24 = vld [vmem:[%s2027_s12 + $0x28] sm:$0xff] }
  0x39   : > { %v522_v6 = vpack.c.b16 %v515_v3, %v514_v2  ;;  %vm501_vm9 = vcmp.ge.f32.partialorder %v2082_v4, -52.0  ;;  %vm447_vm13 = vcmp.gt.f32.partialorder %v2089_v10, 0.0  ;;  %vm2392_vm14 = vcmp.gt.f32.partialorder %v2092_v11, 0.0  ;;  %v480_v36 = vld [vmem:[%s2027_s12 + $0x30] sm:$0xff]  ;;  %v481_v40 = vld [vmem:[%s2027_s12 + $0x38] sm:$0xff]  ;;  %s422_s12 = scalar_lea.vmem %s2384_s5, %s1497_s8  ;;  %s1058_s8 = scalar_lea.sflag [#allocation6], %s2183_s28 }
  0x3a   : > { %v521_v9 = vpack.c.b8 %v520_v5, %v520_v5  ;;  %v463_v22 = vmul.f32 0.99004984, %v455_v13  ;;  %vm2391_vm15 = vcmp.gt.f32.partialorder %v2100_v14, 0.0  ;;  %v464_v27 = vmul.f32 0.99004984, %v456_v15  ;;  %s1619_s16 = sshra.s32 %s2271_s19, 4  ;;  %s1620_s16 = int_to_ptr.hbm [resolvable:$true] %s1619_s16 }
  0x3b   : > { %v523_v12 = vpack.c.b8 %v522_v6, %v522_v6  ;;  %v465_v28 = vmul.f32 0.99004984, %v457_v18  ;;  %v470_v29 = vadd.f32 -0.6467608, %v462_v16  ;;  %v486_v31 = vsel %vm446_vm11, 0.0, %v478_v23  ;;  %p1626_p2 = scmp.lt.s32.totalorder %s1620_s16, %s2386_s7 }
  0x3c   : > { %vm528_vm10 = vnez %v521_v9  ;;  %v487_v32 = vsel %vm447_vm13, 0.0, %v479_v24  ;;  %v1718_v33 = vmov 0.0   ;;  %v471_v35 = vadd.f32 -0.6467608, %v463_v22 }
  0x3d   : > { %vm529_vm12 = vnez %v523_v12  ;;  %v532_v17 = vsel %vm528_vm10, 16843009, %v1717_v58  ;;  %v516_v42 = vunpack.c.2.s8 %v2067_v59  ;;  %v517_v43 = vunpack.c.2.s8 %v2070_v60 }
  0x3e   : > { %v533_v19 = vsel %vm529_vm12, 16843009, %v1717_v58  ;;  %v536_v20 = vunpack.c.0.s8 %v532_v17  ;;  %v537_v21 = vunpack.c.1.s8 %v532_v17  ;;  %v472_v45 = vadd.f32 -0.6467608, %v464_v27 }
  0x3f   : > { %v538_v25 = vunpack.c.0.s8 %v533_v19  ;;  %v539_v26 = vunpack.c.1.s8 %v533_v19  ;;  %v518_v46 = vunpack.c.3.s8 %v2067_v59  ;;  %v519_v47 = vunpack.c.3.s8 %v2070_v60 }
  0x40   : > { %vm544_vm4 = vcmp.ne.s32.totalorder %v536_v20, 0  ;;  %vm545_vm5 = vcmp.ne.s32.totalorder %v537_v21, 0  ;;  %v473_v50 = vadd.f32 -0.6467608, %v465_v28  ;;  %v524_v51 = vpack.c.b16 %v517_v43, %v516_v42 }
  0x41   : > { %vm546_vm10 = vcmp.ne.s32.totalorder %v538_v25, 0  ;;  %vm2112_vm3 = vcmp.ne.s32.totalorder %v539_v26, 0  ;;  %vm552_vm12 = vmor %vm498_vm6, %vm544_vm4  ;;  %v488_v53 = vsel %vm2392_vm14, 0.0, %v480_v36  ;;  %v489_v54 = vsel %vm2391_vm15, 0.0, %v481_v40 }
  0x42   : > { %vm553_vm2 = vmor %vm499_vm7, %vm545_vm5  ;;  %v2124_v34 = vsel %vm552_vm12, 1.0, %v1718_v33  ;;  %v526_v55 = vpack.c.b16 %v519_v47, %v518_v46  ;;  %v2152_v57 = vadd.f32 %v486_v31, %v470_v29  ;;  %v525_v59 = vpack.c.b8 %v524_v51, %v524_v51 }
  0x43   : > { %vm554_vm6 = vmor %vm500_vm8, %vm546_vm10  ;;  %v2132_v44 = vsel %vm553_vm2, 1.0, %v1718_v33  ;;  %v2154_v60 = vadd.f32 %v487_v32, %v471_v35  ;;  %v2156_v63 = vadd.f32 %v488_v53, %v472_v45  ;;  %v2158_v2 = vadd.f32 %v489_v54, %v473_v50 }
  0x44   : > { %vm555_vm7 = vmor %vm501_vm9, %vm2112_vm3  ;;  %v2140_v48 = vsel %vm554_vm6, 1.0, %v1718_v33  ;;  %v576_v49 = vpack.c.bf16 %v2132_v44, %v2124_v34  ;;  %v527_v62 = vpack.c.b8 %v526_v55, %v526_v55  ;;  %vm530_vm2 = vnez %v525_v59 }
  0x45   : > { %v2144_v52 = vsel %vm555_vm7, 1.0, %v1718_v33  ;;  %v534_v3 = vsel %vm530_vm2, 16843009, %v1717_v58  ;;  %vm502_vm8 = vcmp.ge.f32.partialorder %v2152_v57, -52.0  ;;  %vm503_vm9 = vcmp.ge.f32.partialorder %v2154_v60, -52.0 }
  0x46   : > { %v577_v56 = vpack.c.bf16 %v2144_v52, %v2140_v48  ;;  %580 = vst [vmem:[#allocation2] sm:$0xff] %v576_v49  ;;  %vm531_vm3 = vnez %v527_v62  ;;  %v540_v6 = vunpack.c.0.s8 %v534_v3  ;;  %v541_v8 = vunpack.c.1.s8 %v534_v3 }
  0x47   : > { %v535_v5 = vsel %vm531_vm3, 16843009, %v1717_v58  ;;  %vm504_vm4 = vcmp.ge.f32.partialorder %v2156_v63, -52.0  ;;  %vm505_vm5 = vcmp.ge.f32.partialorder %v2158_v2, -52.0  ;;  %v1478_v32 = vadd.f32 -1.0, %v2038_v37 }
  0x48   : > { %581 = vst [vmem:[#allocation2 + $0x8] sm:$0xff] %v577_v56  ;;  %v542_v9 = vunpack.c.0.s8 %v535_v5  ;;  %v543_v12 = vunpack.c.1.s8 %v535_v5  ;;  %vm548_vm10 = vcmp.ne.s32.totalorder %v540_v6, 0  ;;  %vm549_vm12 = vcmp.ne.s32.totalorder %v541_v8, 0 }
  0x49   : > { %vm556_vm2 = vmor %vm502_vm8, %vm548_vm10  ;;  %v1479_v35 = vadd.f32 -1.0, %v2041_v38  ;;  %v1480_v36 = vadd.f32 -1.0, %v2044_v39  ;;  %vm933_vm8 = vcmp.gt.f32.partialorder %v2140_v48, 0.0  ;;  %v1481_v43 = vadd.f32 -1.0, %v2047_v41 }
  0x4a   : > { %vm550_vm6 = vcmp.ne.s32.totalorder %v542_v9, 0  ;;  %vm551_vm7 = vcmp.ne.s32.totalorder %v543_v12, 0  ;;  %vm557_vm3 = vmor %vm503_vm9, %vm549_vm12  ;;  %v2168_v16 = vsel %vm556_vm2, 1.0, %v1718_v33  ;;  %vm934_vm9 = vcmp.gt.f32.partialorder %v2144_v52, 0.0 }
  0x4b   : > { %vm558_vm15 = vmor %vm504_vm4, %vm550_vm6  ;;  %v2170_v19 = vsel %vm557_vm3, 1.0, %v1718_v33  ;;  %v1029_v42 = vsel %vm933_vm8, 5.0, %v1480_v36  ;;  %v1482_v45 = vadd.f32 -1.0, %v2085_v7  ;;  %v1030_v46 = vsel %vm934_vm9, 5.0, %v1481_v43 }
  0x4c   : > { %vm559_vm14 = vmor %vm505_vm5, %vm551_vm7  ;;  %v2174_v22 = vsel %vm558_vm15, 1.0, %v1718_v33  ;;  %v578_v23 = vpack.c.bf16 %v2170_v19, %v2168_v16  ;;  %vm932_vm15 = vcmp.gt.f32.partialorder %v2132_v44, 0.0  ;;  %1037 = vst [vmem:[%s2192_s18 + $0x10] sm:$0xff] %v1029_v42  ;;  %vm935_vm4 = vcmp.gt.f32.partialorder %v2168_v16, 0.0 }
  0x4d   : > { %v1336_v13 = vld [vmem:[#allocation2] sm:$0xf]  ;;  %v1501_v15 = vld [vmem:[#allocation2 + $0x4] sm:$0xf]  ;;  %v2178_v24 = vsel %vm559_vm14, 1.0, %v1718_v33  ;;  %vm931_vm14 = vcmp.gt.f32.partialorder %v2124_v34, 0.0  ;;  %vm1001_vm10 = vmpackc.low %vm934_vm9, %vm932_vm15 }
  0x4e   : > { %v579_v25 = vpack.c.bf16 %v2178_v24, %v2174_v22  ;;  %582 = vst [vmem:[#allocation2 + $0x10] sm:$0xff] %v578_v23  ;;  %v1027_v33 = vsel %vm931_vm14, 5.0, %v1478_v32  ;;  %v1028_v40 = vsel %vm932_vm15, 5.0, %v1479_v35  ;;  %v1031_v47 = vsel %vm935_vm4, 5.0, %v1482_v45  ;;  %vm995_vm5 = vmpackc.low %vm933_vm8, %vm931_vm14 }
  0x4f   : > { %v1502_v17 = vld [vmem:[#allocation2 + $0x4] sm:$0xf0]  ;;  %v1338_v18 = vld [vmem:[#allocation2 + $0x8] sm:$0xf0]  ;;  %1035 = vst [vmem:[%s2192_s18] sm:$0xff] %v1027_v33  ;;  %v997_v49 = vsel %vm995_vm5, 16711935, %v1717_v58 }
  0x50   : > { %v1337_v20 = vor.u32 %v1502_v17, %v1336_v13  ;;  %v1341_v21 = vor.u32 %v1501_v15, %v1338_v18  ;;  %583 = vst [vmem:[#allocation2 + $0x18] sm:$0xff] %v579_v25  ;;  %v1483_v50 = vadd.f32 -1.0, %v2089_v10  ;;  %vm937_vm12 = vcmp.gt.f32.partialorder %v2174_v22, 0.0 }
  0x51   : > { %1036 = vst [vmem:[%s2192_s18 + $0x8] sm:$0xff] %v1028_v40  ;;  %vm936_vm6 = vcmp.gt.f32.partialorder %v2170_v19, 0.0  ;;  %vm996_vm7 = vmpackc.low %vm937_vm12, %vm935_vm4  ;;  %v1484_v51 = vadd.f32 -1.0, %v2092_v11  ;;  %v1003_v55 = vsel %vm1001_vm10, 16711935, %v1717_v58  ;;  %vm938_vm2 = vcmp.gt.f32.partialorder %v2178_v24, 0.0 }
  0x52   : > { %808 = vmatmul.bf16.vlgmr.msra.gmra.mxu0 %v1337_v20  ;;  %827 = vmatmul.bf16.vlgmr.msra.gmra.mxu1 %v1341_v21  ;;  %1038 = vst [vmem:[%s2192_s18 + $0x18] sm:$0xff] %v1030_v46  ;;  %v1032_v56 = vsel %vm936_vm6, 5.0, %v1483_v50  ;;  %v998_v59 = vsel %vm996_vm7, 16711935, %v1717_v58  ;;  %vm1002_vm3 = vmpackc.low %vm938_vm2, %vm936_vm6  ;;  %v1485_v12 = vadd.f32 -1.0, %v2100_v14 }
  0x53   : > { %846 = vmatmul.bf16.vlgmr.msra.gmra.mxu2 %v1337_v20  ;;  %865 = vmatmul.bf16.vlgmr.msra.gmra.mxu3 %v1341_v21  ;;  %1039 = vst [vmem:[%s2192_s18 + $0x20] sm:$0xff] %v1031_v47  ;;  %v999_v3 = vpack.c.b8 %v998_v59, %v997_v49  ;;  %v1033_v5 = vsel %vm937_vm12, 5.0, %v1484_v51  ;;  %v1004_v6 = vsel %vm1002_vm3, 16711935, %v1717_v58 }
  0x54   : > { %1040 = vst [vmem:[%s2192_s18 + $0x28] sm:$0xff] %v1032_v56  ;;  %v1005_v9 = vpack.c.b8 %v1004_v6, %v1003_v55  ;;  %v1034_v17 = vsel %vm938_vm2, 5.0, %v1485_v12 }
  0x55   : > { %v1344_v26 = vld [vmem:[#allocation2 + $0x10] sm:$0xf]  ;;  %v1503_v28 = vld [vmem:[#allocation2 + $0x14] sm:$0xf]  ;;  %1041 = vst [vmem:[%s2192_s18 + $0x30] sm:$0xff] %v1033_v5  ;;  %vm1000_vm5 = vnez %v999_v3 }
  0x56   : > { %v1007_v13 = vsel %vm1000_vm5, 16843009, %v1717_v58  ;;  %vm1006_vm10 = vnez %v1005_v9  ;;  %1042 = vst [vmem:[%s2192_s18 + $0x38] sm:$0xff] %v1034_v17  ;;  %s1621_s18 = scalar_lea.hbm %s1620_s16, 64 }
  0x57   : > { %v1504_v27 = vld [vmem:[#allocation2 + $0x14] sm:$0xf0]  ;;  %v1346_v29 = vld [vmem:[#allocation2 + $0x18] sm:$0xf0]  ;;  %1009 = vst [vmem:[%s422_s12] sm:$0xff] %v1007_v13  ;;  %v1008_v18 = vsel %vm1006_vm10, 16843009, %v1717_v58  ;;  %p1622_p13 = scmp.ne.s32.totalorder %s1620_s16, %s1621_s18  ;;  %p1627_p3 = scmp.lt.s32.totalorder %s1625_s22, %s1621_s18 }
  0x58   : > { %v1345_v30 = vor.u32 %v1504_v27, %v1344_v26  ;;  %v1349_v31 = vor.u32 %v1503_v28, %v1346_v29  ;;  %1010 = vst [vmem:[%s422_s12 + $0x8] sm:$0xff] %v1008_v18 }
  0x59   : > { %p1623_p0 = pnand %p1622_p13, %p1801_p4  ;;  %p1628_p5 = por %p1627_p3, %p1626_p2 }
  0x5b   : > { %p1624_p1 = pneg %p1623_p0 }
  0x5d   : > { %p1629_p6 = pnand %p1628_p5, %p1624_p1 }
  0x62   : > { %813 = vmatmul.bf16.gmra.mxu0 %v1345_v30  ;;  %832 = vmatmul.bf16.gmra.mxu1 %v1349_v31 }
  0x63   : > { %851 = vmatmul.bf16.gmra.mxu2 %v1345_v30  ;;  %870 = vmatmul.bf16.gmra.mxu3 %v1349_v31 }
  0xcf   : > { %v809_v53 = vpop.f32.mrf.mxu0  ;;  %v828_v54 = vpop.f32.mrf.mxu1 }
  0xd0   : > { %v829_v62 = vadd.f32 %v828_v54, %v809_v53 }
  0xd2   : > { %v971_v8 = vadd.f32 %v829_v62, %v2072_v61 }
  0xd4   : > { %v979_v15 = vsel %vm442_vm0, -65.0, %v971_v8 }
  0xd5   : > { %v987_v61 = vsel %vm931_vm14, -65.0, %v979_v15 }
  0xd6   : > { %1011 = vst [vmem:[%s2275_s15] sm:$0xff] %v987_v61  ;;  %v847_v37 = vpop.f32.mrf.mxu2  ;;  %v866_v20 = vpop.f32.mrf.mxu3 }
  0xd7   : > { %v867_v21 = vadd.f32 %v866_v20, %v847_v37  ;;  %v811_v23 = vpop.f32.mrf.mxu0  ;;  %v830_v34 = vpop.f32.mrf.mxu1 }
  0xd8   : > { %v831_v25 = vadd.f32 %v830_v34, %v811_v23 }
  0xd9   : > { %1632 = shalt.err (!%p1629_p6)
}
  0xda   : > { %s1719_s10 = smov 256   ;;  %s1720_s12 = smov 16   ;;  %v972_v58 = vadd.f32 %v867_v21, %v2076_v0  ;;  %v973_v26 = vadd.f32 %v831_v25, %v2078_v1  ;;  %vm2399_vm0 = vcmp.gt.f32.partialorder %v2044_v39, 0.0 }
  0xdb   : > { %1542 = dma.vmem_to_hbm [thread:$0]  (%p1801_p4), %s2269_s9, 1024, %s2271_s19, %s1058_s8, %s1719_s10, %s1719_s10, %s1720_s12  }
  0xdc   : > { %v980_v27 = vsel %vm443_vm1, -65.0, %v972_v58  ;;  %v981_v29 = vsel %vm2399_vm0, -65.0, %v973_v26  ;;  %vm2400_vm1 = vcmp.gt.f32.partialorder %v2047_v41, 0.0  ;;  %s1076_s8 = scalar_lea.hbm %s2385_s6, %s1538_s20  ;;  %s1077_s16 = sshll.u32 %s2275_s15, 4  ;;  %s1078_s16 = int_to_ptr.vmem [resolvable:$true] %s1077_s16 }
  0xdd   : > { %v988_v28 = vsel %vm932_vm15, -65.0, %v980_v27  ;;  %v989_v30 = vsel %vm933_vm8, -65.0, %v981_v29  ;;  %s1079_s18 = sshll.u32 %s1076_s8, 4  ;;  %s1053_s27 = scalar_lea.sflag [#allocation4], %s2183_s28  ;;  %s1080_s18 = int_to_ptr.hbm [resolvable:$true] %s1079_s18 }
  0xde   : > { %1012 = vst [vmem:[%s2275_s15 + $0x8] sm:$0xff] %v988_v28  ;;  %v849_v31 = vpop.f32.mrf.mxu2  ;;  %v868_v0 = vpop.f32.mrf.mxu3  ;;  %s1647_s20 = sshra.s32 %s1080_s18, 4  ;;  %s1653_s23 = scalar_lea.hbm %s2385_s6, 128  ;;  %s1648_s20 = int_to_ptr.hbm [resolvable:$true] %s1647_s20 }
  0xdf   : > { %1013 = vst [vmem:[%s2275_s15 + $0x10] sm:$0xff] %v989_v30  ;;  %v869_v32 = vadd.f32 %v868_v0, %v849_v31  ;;  %v814_v1 = vpop.f32.mrf.mxu0  ;;  %v833_v33 = vpop.f32.mrf.mxu1  ;;  %s1649_s21 = scalar_lea.hbm %s1648_s20, 64  ;;  %p1654_p11 = scmp.lt.s32.totalorder %s1648_s20, %s2385_s6 }
  0xe0   : > { %v834_v38 = vadd.f32 %v833_v33, %v814_v1  ;;  %p1650_p7 = scmp.ne.s32.totalorder %s1648_s20, %s1649_s21  ;;  %p1655_p12 = scmp.lt.s32.totalorder %s1653_s23, %s1649_s21 }
  0xe1   : > { %v974_v35 = vadd.f32 %v869_v32, %v2082_v4 }
  0xe2   : > { %v975_v44 = vadd.f32 %v834_v38, %v2152_v57  ;;  %p1651_p9 = pnand %p1650_p7, %p1801_p4  ;;  %p1656_p13 = por %p1655_p12, %p1654_p11 }
  0xe3   : > { %v982_v39 = vsel %vm2400_vm1, -65.0, %v974_v35 }
  0xe4   : > { %v990_v36 = vsel %vm934_vm9, -65.0, %v982_v39  ;;  %v983_v48 = vsel %vm446_vm11, -65.0, %v975_v44  ;;  %vm2401_vm11 = vcmp.gt.f32.partialorder %v2092_v11, 0.0  ;;  %p1652_p10 = pneg %p1651_p9 }
  0xe5   : > { %1014 = vst [vmem:[%s2275_s15 + $0x18] sm:$0xff] %v990_v36  ;;  %v991_v40 = vsel %vm935_vm4, -65.0, %v983_v48 }
  0xe6   : > { %1015 = vst [vmem:[%s2275_s15 + $0x20] sm:$0xff] %v991_v40  ;;  %v852_v4 = vpop.f32.mrf.mxu2  ;;  %v871_v42 = vpop.f32.mrf.mxu3  ;;  %p1657_p0 = pnand %p1656_p13, %p1652_p10 }
  0xe7   : > { %v872_v57 = vadd.f32 %v871_v42, %v852_v4  ;;  %v816_v41 = vpop.f32.mrf.mxu0  ;;  %v835_v43 = vpop.f32.mrf.mxu1 }
  0xe8   : > { %v836_v45 = vadd.f32 %v835_v43, %v816_v41 }
  0xe9   : > { %v976_v52 = vadd.f32 %v872_v57, %v2154_v60 }
  0xea   : > { %v977_v7 = vadd.f32 %v836_v45, %v2156_v63 }
  0xeb   : > { %v984_v46 = vsel %vm447_vm13, -65.0, %v976_v52  ;;  %vm2402_vm13 = vcmp.gt.f32.partialorder %v2100_v14, 0.0 }
  0xec   : > { %v992_v16 = vsel %vm936_vm6, -65.0, %v984_v46  ;;  %v985_v47 = vsel %vm2401_vm11, -65.0, %v977_v7 }
  0xed   : > { %1016 = vst [vmem:[%s2275_s15 + $0x28] sm:$0xff] %v992_v16  ;;  %v993_v49 = vsel %vm937_vm12, -65.0, %v985_v47 }
  0xee   : > { %1017 = vst [vmem:[%s2275_s15 + $0x30] sm:$0xff] %v993_v49  ;;  %v854_v10 = vpop.f32.mrf.mxu2  ;;  %v873_v60 = vpop.f32.mrf.mxu3 }
  0xef   : > { %v874_v63 = vadd.f32 %v873_v60, %v854_v10 }
  0xf1   : > { %v978_v11 = vadd.f32 %v874_v63, %v2158_v2 }
  0xf3   : > { %v986_v19 = vsel %vm2402_vm13, -65.0, %v978_v11 }
  0xf4   : > { %v994_v22 = vsel %vm938_vm2, -65.0, %v986_v19 }
  0xf5   : > { %1018 = vst [vmem:[%s2275_s15 + $0x38] sm:$0xff] %v994_v22 }
  0xf6   : > { %1660 = shalt.err (!%p1657_p0)
}
  0xf7   : > { %1541 = dma.vmem_to_hbm [thread:$0]  (%p1801_p4), %s1078_s16, 1024, %s1080_s18, %s1053_s27, %s1719_s10, %s1719_s10, %s1720_s12  }
  0xf8 PF: > { %p1552_p1 = scmp.ge.s32.totalorder %s1715_s29, 2  ;;  %s1126_s28 = sand.u32 1, %s1695_s24  }
  0xf9   : > { %s1127_s15 = scalar_lea.sflag [#allocation4], %s1126_s28 }
  0xfa   : > { %p1546_p2 = pnand %p1552_p1, %p1808_p8 }
  0xfc   : > { %p1547_p3 = pneg %p1546_p2 }
  0xfe   : > { %1686 = dma.done.wait (%p1547_p3), %s1127_s15, 1024  }
  0xff   : > { %1688 = vsyncadd (%p1547_p3), %s1127_s15, 4294966272  ;;  %s1137_s19 = scalar_lea.sflag [#allocation6], %s1126_s28 }
 0x100   : > { %1690 = dma.done.wait (%p1547_p3), %s1137_s19, 1024  }
 0x101   : > { %1692 = vsyncadd (%p1547_p3), %s1137_s19, 4294966272  ;;  %s24_s29 = sadd.s32 1, %s1715_s29   ;;  %s2403_s27 = sld [smem:[#allocation9_spill]] }
 0x102   : > { %p21_p5 = scmp.ge.s32.totalorder %s24_s29, 4   ;;  %s2404_s28 = sld [smem:[#allocation10_spill]] }
 0x103   : > { %s2405_s24 = smov %s1699_s25  ;;  %s2406_s25 = smov %s1703_s26 }
 0x104   : > { %s2407_s26 = smov %s1814_s14  ;;  %23 = sbr.rel (!%p21_p5) target bundleno = 6 (0x6), region = 124 }
 0x109   :  { %1143 = vsyncpa [#allocation4], 1 }
 0x10a   :  { %1145 = vsyncpa [#allocation4 + $0x1], 1 }
 0x10b   :  { %1146 = vsyncpa [#allocation6], 1 }
 0x10c   :  { %1148 = vsyncpa [#allocation6 + $0x1], 1 }

</bundles_post_ra>
